<compile_context>
chip_gen: v7x
topology: tpu7x:2x2x1
jax: 0.10.0
libtpu: 0.0.40
codegen_flags: <defaults>
</compile_context>

<pallas_src>
from collections import OrderedDict

import jax
import jax.numpy as jnp
from jax.experimental import pallas as pl
from jax.experimental.pallas import tpu as pltpu


_LANE = 128     # lane width: lane-dense output dims are multiples of this
_SUBLANE = 8    # f32 sublane width for the batch (second-to-last) dim


def _round_up(n: int, m: int) -> int:
    return ((n + m - 1) // m) * m


def _pad2d(a, rows, cols):
    r, c = a.shape
    if r == rows and c == cols:
        return a
    return jnp.pad(a, ((0, rows - r), (0, cols - c)))


# ----------------------------------------------------------------------------
# Fused kernel: chain of  h = relu(h @ W_i + b_i)  entirely on-chip.
#   refs = (x_ref, w1_ref, b1_ref, ..., wN_ref, bN_ref, o_ref)
# Weights arrive pre-cast to bf16 (MXU-native on v5e/v6e/v7x); bias add and
# ReLU are done in f32.  Intermediates never leave VMEM/vregs.
# ----------------------------------------------------------------------------
def _fused_mlp_kernel(*refs):
    x_ref, o_ref = refs[0], refs[-1]
    wb_refs = refs[1:-1]
    h = x_ref[...].astype(jnp.float32)
    for i in range(0, len(wb_refs), 2):
        w = wb_refs[i][...]            # bf16 (K_i, Dout_p_i), VMEM-resident
        b = wb_refs[i + 1][...]        # f32  (1,   Dout_p_i) — broadcasts
        h = jnp.dot(h.astype(jnp.bfloat16), w,
                    preferred_element_type=jnp.float32)
        h = jnp.maximum(h + b, 0.0)    # bias + ReLU in f32
    o_ref[...] = h.astype(o_ref.dtype)


def fused_linear_relu_chain(x, weights, biases, out_dim, *, tb_max=512):
    """x: [B, K0] (logical).  weights[i]: bf16 [K_i, Dout_p_i] (pre-padded),
    biases[i]: f32 [1, Dout_p_i] (pre-padded).  Returns [B, out_dim].

    Single pallas_call with a batch grid axis: x/out tiles stream (double-
    buffered), weights/biases stay VMEM-resident across batch tiles.
    """
    B, D0 = x.shape
    assert weights[0].shape[0] == D0, "first-layer weight rows must match x"
    dn_p = weights[-1].shape[1]

    # Batch tile: biggest up to tb_max, (8,128)-legal (multiple of 8).
    TB = min(_round_up(B, _SUBLANE), tb_max)
    grid = (pl.cdiv(B, TB),)

    in_specs = [pl.BlockSpec((TB, D0), lambda i: (i, 0))]
    flat_params = []
    for w, b in zip(weights, biases):
        kw, nw = w.shape
        # Constant block index -> DMA'd once, resident across all batch tiles.
        in_specs.append(pl.BlockSpec((kw, nw), lambda i: (0, 0)))
        in_specs.append(pl.BlockSpec((1, nw), lambda i: (0, 0)))
        flat_params += [w, b]

    # Advisory cost estimate for XLA's scheduler.
    flops = sum(2 * B * w.shape[0] * w.shape[1] for w in weights)
    bytes_accessed = (x.size * x.dtype.itemsize
                      + sum(w.size * w.dtype.itemsize for w in weights)
                      + sum(b.size * b.dtype.itemsize for b in biases)
                      + B * dn_p * x.dtype.itemsize)

    # VMEM budget: resident params + double-buffered x/out tiles + live f32
    # intermediate.  Clamp to [32 MiB, 64 MiB] so it is safe on v7x (64 MiB
    # physical) while still well above v5e/v6e default scoped limits.
    resident = (sum(w.size * w.dtype.itemsize for w in weights)
                + sum(b.size * b.dtype.itemsize for b in biases))
    tile_bytes = 2 * (TB * D0 * 4 + TB * dn_p * 4)          # double-buffered
    inter_bytes = TB * max(w.shape[1] for w in weights) * 4  # largest live h
    vmem_limit = int(min(64 << 20,
                         max(2 * (resident + tile_bytes + inter_bytes),
                             32 << 20)))

    out = pl.pallas_call(
        _fused_mlp_kernel,
        out_shape=jax.ShapeDtypeStruct((B, dn_p), x.dtype),
        grid=grid,
        in_specs=in_specs,
        out_specs=pl.BlockSpec((TB, dn_p), lambda i: (i, 0)),
        compiler_params=pltpu.CompilerParams(
            dimension_semantics=("parallel",),   # shard batch tiles on v7x 2 TCs
            vmem_limit_bytes=vmem_limit),
        cost_estimate=pl.CostEstimate(flops=flops, transcendentals=0,
                                      bytes_accessed=bytes_accessed),
    )(x, *flat_params)

    # Single slice at the chain end recovers the logical feature width.
    if out_dim != dn_p:
        out = out[:, :out_dim]
    return out


# ----------------------------------------------------------------------------
# Submodule: takes (dataset, x) like the PyTorch children of MySequential_only_x.
# Parameters are padded/cast ONCE here (not per forward call):
#   w_first: (Din, Dout_p)   bf16 — for logical (unpadded) inputs (layer 0 /
#                                    standalone use)
#   w_chain: (Din_p, Dout_p) bf16 — for lane-dense padded inputs from a
#                                    previous fused layer
#   b_pad:   (1, Dout_p)     f32
# Zero padding is exact for matmul + bias + ReLU.
# ----------------------------------------------------------------------------
class DatasetLinearReLU:
    """A (dataset, x) -> x head; `dataset` is accepted but unused in compute."""

    def __init__(self, w, b):
        w = jnp.asarray(w, dtype=jnp.float32)
        b = jnp.asarray(b, dtype=jnp.float32).reshape(1, -1)
        din, dout = w.shape
        din_p = _round_up(din, _LANE)
        dout_p = _round_up(dout, _LANE)
        self.in_dim = din
        self.out_dim = dout
        self.w_first = _pad2d(w, din, dout_p).astype(jnp.bfloat16)
        self.w_chain = _pad2d(w, din_p, dout_p).astype(jnp.bfloat16)
        self.b_pad = _pad2d(b, 1, dout_p)

    def __call__(self, dataset, x):
        return fused_linear_relu_chain(x, [self.w_first], [self.b_pad],
                                       self.out_dim)


# ----------------------------------------------------------------------------
# The container: forward semantics of MySequential_only_x.  When every child
# is a linear+ReLU head, the whole chain is fused into one pallas_call (the
# parameter list for the fused path is assembled once at construction); this
# is mathematically identical to chaining the children one by one, but the
# intermediates never touch HBM.
# ----------------------------------------------------------------------------
class MySequentialOnlyX:
    def __init__(self, *args):
        if len(args) == 1 and isinstance(args[0], OrderedDict):
            self._modules = list(args[0].values())
        else:
            self._modules = list(args)

        self._fused = None
        if self._modules and all(isinstance(m, DatasetLinearReLU)
                                 for m in self._modules):
            ws = [self._modules[0].w_first]
            bs = [self._modules[0].b_pad]
            for m in self._modules[1:]:
                ws.append(m.w_chain)   # rows padded to previous layer's lane-dense width
                bs.append(m.b_pad)
            self._fused = (ws, bs, self._modules[-1].out_dim)

    def __call__(self, dataset, x):
        if self._fused is not None:
            ws, bs, out_dim = self._fused
            return fused_linear_relu_chain(x, ws, bs, out_dim)
        # General path: exact `for m in modules: x = m(dataset, x)` chaining.
        for module in self._modules:
            x = module(dataset, x)
        return x


# ----------------------------------------------------------------------------
# Pure-JAX references for the correctness check.
# ----------------------------------------------------------------------------
def _ref_forward_f32(x, params):
    for w, b in params:
        x = jnp.maximum(jnp.dot(x, w) + b, 0.0)
    return x


def _ref_forward_bf16(x, params):
    # Same bf16-operand / f32-accumulate recipe the kernel uses.
    h = x
    for w, b in params:
        h = jnp.dot(h.astype(jnp.bfloat16), w.astype(jnp.bfloat16),
                    preferred_element_type=jnp.float32)
        h = jnp.maximum(h + b, 0.0)
    return h


if __name__ == "__main__":
    key = jax.random.PRNGKey(0)
    k_x, k_w1, k_b1, k_w2, k_b2 = jax.random.split(key, 5)

    batch, hidden_in, hidden_mid, hidden_out = 8, 32, 64, 32

    x = jax.random.normal(k_x, (batch, hidden_in), dtype=jnp.float32)

    w1 = jax.random.normal(k_w1, (hidden_in, hidden_mid), dtype=jnp.float32) * 0.1
    b1 = jax.random.normal(k_b1, (1, hidden_mid), dtype=jnp.float32) * 0.1
    w2 = jax.random.normal(k_w2, (hidden_mid, hidden_out), dtype=jnp.float32) * 0.1
    b2 = jax.random.normal(k_b2, (1, hidden_out), dtype=jnp.float32) * 0.1

    model = MySequentialOnlyX(
        DatasetLinearReLU(w1, b1),
        DatasetLinearReLU(w2, b2),
    )

    dataset = "synthetic"  # threaded through the sequential, unused by these heads
    fwd = jax.jit(lambda xx: model(dataset, xx))
    out = jax.block_until_ready(fwd(x))

    ref_bf16 = _ref_forward_bf16(x, [(w1, b1), (w2, b2)])
    ref_f32 = _ref_forward_f32(x, [(w1, b1), (w2, b2)])

    assert out.shape == (batch, hidden_out)
    # Exact (up to accumulation order) vs. the matched bf16-operand reference.
    assert jnp.allclose(out, ref_bf16, atol=1e-4, rtol=1e-4)
    # Loose check vs. the pure-f32 reference (bf16 MXU operands).
    assert jnp.allclose(out, ref_f32, atol=3e-2, rtol=3e-2)

    print("KERNEL_OK")
</pallas_src>

<mosaic_0001>
module attributes {stable_mosaic.version = 11 : i64} {
  func.func @_fused_mlp_kernel(%arg0: i32, %arg1: memref<8x32xf32, #tpu.memory_space<vmem>>, %arg2: memref<32x128xbf16, #tpu.memory_space<vmem>>, %arg3: memref<1x128xf32, #tpu.memory_space<vmem>>, %arg4: memref<128x128xbf16, #tpu.memory_space<vmem>>, %arg5: memref<1x128xf32, #tpu.memory_space<vmem>>, %arg6: memref<8x128xf32, #tpu.memory_space<vmem>>) attributes {dimension_semantics = [#tpu.dimension_semantics<parallel>], iteration_bounds = array<i64: 1>, scalar_prefetch = 0 : i64, scratch_operands = 0 : i64, tpu.core_type = #tpu.core_type<tc>, window_params = [{transform_indices = @transform_0, window_bounds = array<i64: 8, 32>}, {pipeline_mode = #tpu.pipeline_mode<synchronous>, transform_indices = @transform_1, window_bounds = array<i64: 32, 128>}, {pipeline_mode = #tpu.pipeline_mode<synchronous>, transform_indices = @transform_2, window_bounds = array<i64: 1, 128>}, {pipeline_mode = #tpu.pipeline_mode<synchronous>, transform_indices = @transform_3, window_bounds = array<i64: 128, 128>}, {pipeline_mode = #tpu.pipeline_mode<synchronous>, transform_indices = @transform_4, window_bounds = array<i64: 1, 128>}, {transform_indices = @transform_5, window_bounds = array<i64: 8, 128>}]} {
    %c0 = arith.constant 0 : index
    %c0_0 = arith.constant 0 : index
    %0 = vector.load %arg1[%c0, %c0_0] : memref<8x32xf32, #tpu.memory_space<vmem>>, vector<8x32xf32>
    %c0_1 = arith.constant 0 : index
    %c0_2 = arith.constant 0 : index
    %1 = vector.load %arg2[%c0_1, %c0_2] : memref<32x128xbf16, #tpu.memory_space<vmem>>, vector<32x128xbf16>
    %c0_3 = arith.constant 0 : index
    %c0_4 = arith.constant 0 : index
    %2 = vector.load %arg3[%c0_3, %c0_4] : memref<1x128xf32, #tpu.memory_space<vmem>>, vector<1x128xf32>
    %3 = arith.truncf %0 : vector<8x32xf32> to vector<8x32xbf16>
    %cst = arith.constant dense<0.000000e+00> : vector<8x128xf32>
    %4 = tpu.matmul %3, %1, %cst {dimension_numbers = #tpu.dot_dimension_numbers<[1], [0], [0], [1], [0, 0, 1, 1], [], []>} : vector<8x32xbf16>, vector<32x128xbf16>, vector<8x128xf32> -> vector<8x128xf32>
    %5 = vector.broadcast %2 : vector<1x128xf32> to vector<8x128xf32>
    %6 = arith.addf %4, %5 : vector<8x128xf32>
    %cst_5 = arith.constant 0.000000e+00 : f32
    %7 = vector.broadcast %cst_5 : f32 to vector<8x128xf32>
    %8 = arith.maximumf %6, %7 : vector<8x128xf32>
    %c0_6 = arith.constant 0 : index
    %c0_7 = arith.constant 0 : index
    %9 = vector.load %arg4[%c0_6, %c0_7] : memref<128x128xbf16, #tpu.memory_space<vmem>>, vector<128x128xbf16>
    %c0_8 = arith.constant 0 : index
    %c0_9 = arith.constant 0 : index
    %10 = vector.load %arg5[%c0_8, %c0_9] : memref<1x128xf32, #tpu.memory_space<vmem>>, vector<1x128xf32>
    %11 = arith.truncf %8 : vector<8x128xf32> to vector<8x128xbf16>
    %cst_10 = arith.constant dense<0.000000e+00> : vector<8x128xf32>
    %12 = tpu.matmul %11, %9, %cst_10 {dimension_numbers = #tpu.dot_dimension_numbers<[1], [0], [0], [1], [0, 0, 1, 1], [], []>} : vector<8x128xbf16>, vector<128x128xbf16>, vector<8x128xf32> -> vector<8x128xf32>
    %13 = vector.broadcast %10 : vector<1x128xf32> to vector<8x128xf32>
    %14 = arith.addf %12, %13 : vector<8x128xf32>
    %cst_11 = arith.constant 0.000000e+00 : f32
    %15 = vector.broadcast %cst_11 : f32 to vector<8x128xf32>
    %16 = arith.maximumf %14, %15 : vector<8x128xf32>
    %c0_12 = arith.constant 0 : index
    %c0_13 = arith.constant 0 : index
    %17 = vector.load %arg6[%c0_12, %c0_13] : memref<8x128xf32, #tpu.memory_space<vmem>>, vector<8x128xf32>
    tpu.vector_store %arg6[%c0_12, %c0_13], %16 {strides = array<i32>} : memref<8x128xf32, #tpu.memory_space<vmem>>, vector<8x128xf32>,
    return
  }
  func.func @transform_0(%arg0: i32) -> (i32, i32) {
    %c0_i32 = arith.constant 0 : i32
    %c0_i32_0 = arith.constant 0 : i32
    return %arg0, %c0_i32 : i32, i32
  }
  func.func @transform_1(%arg0: i32) -> (i32, i32) {
    %c0_i32 = arith.constant 0 : i32
    %c0_i32_0 = arith.constant 0 : i32
    %c0_i32_1 = arith.constant 0 : i32
    return %c0_i32, %c0_i32_0 : i32, i32
  }
  func.func @transform_2(%arg0: i32) -> (i32, i32) {
    %c0_i32 = arith.constant 0 : i32
    %c0_i32_0 = arith.constant 0 : i32
    %c0_i32_1 = arith.constant 0 : i32
    return %c0_i32, %c0_i32_0 : i32, i32
  }
  func.func @transform_3(%arg0: i32) -> (i32, i32) {
    %c0_i32 = arith.constant 0 : i32
    %c0_i32_0 = arith.constant 0 : i32
    %c0_i32_1 = arith.constant 0 : i32
    return %c0_i32, %c0_i32_0 : i32, i32
  }
  func.func @transform_4(%arg0: i32) -> (i32, i32) {
    %c0_i32 = arith.constant 0 : i32
    %c0_i32_0 = arith.constant 0 : i32
    %c0_i32_1 = arith.constant 0 : i32
    return %c0_i32, %c0_i32_0 : i32, i32
  }
  func.func @transform_5(%arg0: i32) -> (i32, i32) {
    %c0_i32 = arith.constant 0 : i32
    %c0_i32_0 = arith.constant 0 : i32
    return %arg0, %c0_i32 : i32, i32
  }
}

</mosaic_0001>

<bundles_post_ra>
// kernel: _lambda_.1
= control target key start
LH: loop header
LB: loop body
LE: loop exit
PB: predicated region body
PF: predicated region fallthrough
CT: control target
= control target key end

     0   :  { %10 = vsyncpa [#allocation3], 0  ;;  %s482_s0 = inlined_call_operand.hbm [shape: f32[8,32], index: 0, kind: input, shape index: {}]   ;;  %s483_s1 = inlined_call_operand.vmem [shape: bf16[32,128], index: 1, kind: input, shape index: {}]   ;;  %s484_s2 = inlined_call_operand.vmem [shape: f32[1,128], index: 2, kind: input, shape index: {}]   ;;  %s485_s3 = inlined_call_operand.hbm [shape: bf16[128,128], index: 3, kind: input, shape index: {}]   ;;  %s486_s4 = inlined_call_operand.vmem [shape: f32[1,128], index: 4, kind: input, shape index: {}]   ;;  %s487_s5 = inlined_call_operand.hbm [shape: f32[8,128], index: 5, kind: output, shape index: {}]  }
   0x1   :  { %11 = vsyncpa [#allocation6], 0 }
   0x2   :  { %12 = vsyncpa [#allocation4], 0  ;;  %s390_s18 = smov [#allocation2]   ;;  %s391_s20 = smov [#allocation5]  }
   0x3   :  { %s19_s19 = sshll.u32 %s390_s18, 4  ;;  %s32_s21 = sshll.u32 %s391_s20, 4  ;;  %s20_s19 = int_to_ptr.vmem [resolvable:$true] %s19_s19  ;;  %s427_s21 = int_to_ptr.vmem [resolvable:$true] %s32_s21 }
   0x4   :  { %s318_s24 = scalar_lea.hbm %s482_s0, 128 }
   0x5   :  { %p319_p0 = scmp.ne.s32.totalorder %s482_s0, %s318_s24  ;;  %p322_p1 = scmp.lt.u32.totalorder %s318_s24, %s482_s0 }
   0x7   :  { %p324_p2 = pnand %p322_p1, %p319_p0 }
   0x9   :  { %327 = shalt.err (!%p324_p2)
}
   0xa   :  { %s328_s29 = scalar_lea.vmem %s20_s19, 128  ;;  %p333_p4 = scmp.lt.s32.totalorder %s20_s19, %s20_s19 }
   0xb   :  { %p329_p3 = scmp.ne.s32.totalorder %s20_s19, %s328_s29  ;;  %p334_p5 = scmp.lt.s32.totalorder %s328_s29, %s328_s29 }
   0xd   :  { %p335_p6 = por %p334_p5, %p333_p4 }
   0xf   :  { %p336_p7 = pnand %p335_p6, %p329_p3 }
  0x11   :  { %339 = shalt.err (!%p336_p7)
}
  0x12   :  { %22 = dma.hbm_to_vmem [thread:$0]  %s482_s0, 128, %s20_s19, [#allocation3]  }
  0x13   :  { %s340_s9 = scalar_lea.hbm %s485_s3, 1024 }
  0x14   :  { %p341_p8 = scmp.ne.s32.totalorder %s485_s3, %s340_s9  ;;  %p344_p9 = scmp.lt.u32.totalorder %s340_s9, %s485_s3 }
  0x16   :  { %p346_p10 = pnand %p344_p9, %p341_p8 }
  0x18   :  { %349 = shalt.err (!%p346_p10)
}
  0x19   :  { %s350_s14 = scalar_lea.vmem %s427_s21, 1024  ;;  %p355_p12 = scmp.lt.s32.totalorder %s427_s21, %s427_s21 }
  0x1a   :  { %p351_p11 = scmp.ne.s32.totalorder %s427_s21, %s350_s14  ;;  %p356_p13 = scmp.lt.s32.totalorder %s350_s14, %s350_s14 }
  0x1c   :  { %p357_p0 = por %p356_p13, %p355_p12 }
  0x1e   :  { %p358_p1 = pnand %p357_p0, %p351_p11 }
  0x20   :  { %361 = shalt.err (!%p358_p1)
}
  0x21   :  { %s392_s0 = smov 64   ;;  %s393_s15 = smov 4  }
  0x22   :  { %38 = dma.hbm_to_vmem [thread:$0]  %s485_s3, 1024, %s427_s21, [#allocation6], %s392_s0, %s392_s0, %s393_s15  }
  0x23   :  { %384 = dma.done.wait [#allocation3], 128  }
  0x24   :  { %385 = vsyncadd [#allocation3], 4294967168 }
  0x25   :  { %386 = dma.done.wait [#allocation6], 1024  }
  0x26   :  { %387 = vsyncadd [#allocation6], 4294966272  ;;  %v394_v0 = vmov 0.0   ;;  %vm395_vm0 = vmmov 0   ;;  %v308_v1 = vld [vmem:[%s483_s1] sm:$0xff]   ;;  %v309_v2 = vld [vmem:[%s483_s1 + $0x8] sm:$0xff]  }
  0x27   :  { %273 = vmatprep.subr.bf16.mxu0 %v394_v0  ;;  %277 = vmatprep.mubr.msk.bf16.mxu0 %vm395_vm0, %v394_v0  ;;  %v48_v3 = vld [vmem:[#allocation2] sm:$0xff]  ;;  %v310_v4 = vld [vmem:[#allocation5] sm:$0xff]   ;;  %v311_v6 = vld [vmem:[#allocation5 + $0x8] sm:$0xff]   ;;  %vm73_vm1 = vcmask 261120   ;;  %s396_s24 = smov [#allocation7]  }
  0x28   :  { %281 = vmatprep.subr.bf16.mxu1 %v394_v0  ;;  %297 = vmatprep.mubr.msk.bf16.mxu1 %vm395_vm0, %v394_v0  ;;  %v54_v5 = vpack.c.bf16 %v48_v3, %v48_v3  ;;  %v312_v7 = vld [vmem:[#allocation5 + $0x10] sm:$0xff]   ;;  %v313_v8 = vld [vmem:[#allocation5 + $0x18] sm:$0xff]   ;;  %v314_v9 = vld [vmem:[#allocation5 + $0x20] sm:$0xff]   ;;  %s238_s25 = sshll.u32 %s396_s24, 4  ;;  %s239_s25 = int_to_ptr.vmem [resolvable:$true] %s238_s25 }
  0x29   :  { %274 = vmatpush3.bf16.msra.mxu0 %v308_v1  ;;  %282 = vmatpush3.bf16.msra.mxu1 %v310_v4  ;;  %v315_v10 = vld [vmem:[#allocation5 + $0x28] sm:$0xff]   ;;  %v316_v11 = vld [vmem:[#allocation5 + $0x30] sm:$0xff]   ;;  %v317_v12 = vld [vmem:[#allocation5 + $0x38] sm:$0xff]   ;;  %p367_p3 = scmp.lt.s32.totalorder %s239_s25, %s239_s25 }
  0x2a   :  { %275 = vmatprep.subr.bf16.mxu0 %v394_v0  ;;  %283 = vmatprep.subr.bf16.mxu1 %v394_v0  ;;  %v248_v13 = vld [vmem:[%s484_s2] ss:$0 sm:$0xff]  ;;  %s362_s2 = scalar_lea.vmem %s239_s25, 128 }
  0x2b   :  { %v252_v21 = vld [vmem:[%s486_s4] ss:$0 sm:$0xff]  ;;  %p363_p2 = scmp.ne.s32.totalorder %s239_s25, %s362_s2  ;;  %p368_p4 = scmp.lt.s32.totalorder %s362_s2, %s362_s2 }
  0x2d   :  { %276 = vmatpush3.bf16.msra.mxu0 %v309_v2  ;;  %284 = vmatpush3.bf16.msra.mxu1 %v311_v6  ;;  %p369_p5 = por %p368_p4, %p367_p3 }
  0x2e   :  { %285 = vmatprep.subr.bf16.mxu1 %v394_v0 }
  0x2f   :  { %p370_p6 = pnand %p369_p5, %p363_p2 }
  0x30   :  { %278 = vmatmul.mubr.msk.bf16.vlgmr.msra.gmra.mrb[0].mxu0 %vm73_vm1, %v54_v5 }
  0x31   :  { %286 = vmatpush3.bf16.msra.mxu1 %v312_v7 }
  0x32   :  { %287 = vmatprep.subr.bf16.mxu1 %v394_v0 }
  0x35   :  { %288 = vmatpush3.bf16.msra.mxu1 %v313_v8 }
  0x36   :  { %289 = vmatprep.subr.bf16.mxu1 %v394_v0 }
  0x39   :  { %290 = vmatpush3.bf16.msra.mxu1 %v314_v9 }
  0x3a   :  { %291 = vmatprep.subr.bf16.mxu1 %v394_v0 }
  0x3d   :  { %292 = vmatpush3.bf16.msra.mxu1 %v315_v10 }
  0x3e   :  { %293 = vmatprep.subr.bf16.mxu1 %v394_v0 }
  0x41   :  { %294 = vmatpush3.bf16.msra.mxu1 %v316_v11 }
  0x42   :  { %295 = vmatprep.subr.bf16.mxu1 %v394_v0 }
  0x45   :  { %296 = vmatpush3.bf16.msra.mxu1 %v317_v12 }
 0x103   :  { %v111_v14 = vpop.f32.mrb[0].mxu0 }
 0x104   :  { %v112_v15 = vadd.f32 %v248_v13, %v111_v14  ;;  %v279_v16 = vpop.f32.mrb[1].mxu0 }
 0x105   :  { %v114_v17 = vpop.f32.mrb[2].mxu0 }
 0x106   :  { %v117_v18 = vmax.f32 %v112_v15, 0.0  ;;  %v280_v19 = vpop.f32.mrb[3].mxu0 }
 0x108   :  { %v135_v20 = vpack.c.bf16 %v117_v18, %v117_v18 }
 0x10a   :  { %298 = vmatmul.mubr.bf16.vlgmr.msra.gmra.mrb[0].mxu1 %v135_v20 }
 0x1dd   :  { %v224_v22 = vpop.f32.mrb[0].mxu1 }
 0x1de   :  { %v225_v23 = vadd.f32 %v252_v21, %v224_v22  ;;  %v299_v24 = vpop.f32.mrb[1].mxu1 }
 0x1df   :  { %v227_v25 = vpop.f32.mrb[2].mxu1 }
 0x1e0   :  { %v230_v26 = vmax.f32 %v225_v23, 0.0  ;;  %v300_v27 = vpop.f32.mrb[3].mxu1 }
 0x1e2   :  { %231 = vst [vmem:[#allocation7] sm:$0xff] %v230_v26 }
 0x1e3   :  { %373 = shalt.err (!%p370_p6)
}
 0x1e4   :  { %s374_s4 = scalar_lea.hbm %s487_s5, 128 }
 0x1e5   :  { %p375_p7 = scmp.ne.s32.totalorder %s487_s5, %s374_s4  ;;  %p378_p8 = scmp.lt.u32.totalorder %s374_s4, %s487_s5 }
 0x1e7   :  { %p380_p9 = pnand %p378_p8, %p375_p7 }
 0x1e9   :  { %383 = shalt.err (!%p380_p9)
}
 0x1ea   :  { %241 = dma.vmem_to_hbm [thread:$0]  %s239_s25, 128, %s487_s5, [#allocation4]  }
 0x1eb   :  { %388 = dma.done.wait [#allocation4], 128  }
 0x1ec   :  { %389 = vsyncadd [#allocation4], 4294967168 }
 0x1ed   :  { %245 = vsyncpa [#allocation3], 1 }
 0x1ee   :  { %246 = vsyncpa [#allocation6], 1 }
 0x1ef   :  { %247 = vsyncpa [#allocation4], 1 }

</bundles_post_ra>
